<compile_context>
chip_gen: v7x
topology: tpu7x:2x2x1
jax: 0.10.0
libtpu: 0.0.40
codegen_flags: <defaults>
</compile_context>

<pallas_src>
import functools

import jax
import jax.numpy as jnp
from jax import lax
from jax.experimental import pallas as pl
from jax.experimental.pallas import tpu as pltpu


def lambda_layer_reference(x: jax.Array, planes: int) -> jax.Array:
    """Pure-JAX reference of the canonical LambdaLayer lambda."""
    pad = planes // 4
    sub = x[:, :, ::2, ::2]
    return jnp.pad(sub, ((0, 0), (pad, pad), (0, 0), (0, 0)))


def _shortcut_kernel(x_ref, s_ref, o_ref, *, bt, c, pad, hw_out):
    # x_ref: (bt*c,      h*w)     lane-dense rows, one per (batch, channel)
    # s_ref: (h*w,       hw_out)  0/1 selection matrix (even rows & even cols)
    # o_ref: (bt*c_out,  hw_out)  lane-dense flat output rows
    c_out = c + 2 * pad

    # One MXU matmul gathers the even-row/even-col pixels of every channel in
    # the tile; exactly one nonzero per S column, so the result equals the
    # strided subsample (HIGHEST precision keeps f32 inputs bit-accurate).
    y = jnp.dot(x_ref[...], s_ref[...],
                preferred_element_type=jnp.float32,
                precision=lax.Precision.HIGHEST)          # (bt*c, hw_out)
    y = y.astype(o_ref.dtype)

    if pad == 0:
        o_ref[...] = y
        return

    # Zero only the pad-channel rows; data rows are written exactly once.
    # All stores are full lane width (hw_out lanes).
    zeros = jnp.zeros((pad, hw_out), dtype=o_ref.dtype)
    for b in range(bt):
        base = b * c_out
        o_ref[base:base + pad, :] = zeros
        o_ref[base + pad:base + pad + c, :] = y[b * c:(b + 1) * c, :]
        o_ref[base + pad + c:base + c_out, :] = zeros


def _round_up(v, m):
    return (v + m - 1) // m * m


def _sublane_tile(dtype):
    # f32 -> 8, bf16/f16 -> 16, int8/fp8 -> 32 (sub-32-bit packs along sublanes)
    return max(8, 32 // jnp.dtype(dtype).itemsize)


def _pick_batch_tile(n, c, c_out, hw, hw_out, dtype, budget_bytes, hard_cap=128):
    """Largest legal divisor of n whose pipelined blocks fit the VMEM budget."""
    item = jnp.dtype(dtype).itemsize
    sub = _sublane_tile(dtype)
    lane_in = _round_up(hw, 128)
    lane_out = _round_up(hw_out, 128)

    def legal(bt):
        # (8,128)-rule on the second-to-last block dims: divisible by the
        # sublane tile, or the block equals the full array extent (bt == n).
        return bt == n or ((bt * c) % sub == 0 and (bt * c_out) % sub == 0)

    def live_bytes(bt):
        rin = _round_up(bt * c, sub)
        rout = _round_up(bt * c_out, sub)
        # 2 pipeline buffers for input, 2 for output, plus one output-sized
        # VMEM scratch for the materialized matmul result.
        return (2 * rin * lane_in + 3 * rout * lane_out) * item

    divisors = [d for d in range(1, n + 1) if n % d == 0]
    legal_divs = [d for d in divisors if legal(d)] or [n]
    fitting = [d for d in legal_divs
               if d <= hard_cap and live_bytes(d) <= budget_bytes]
    if not fitting:
        return min(legal_divs)
    # Prefer >= 2 grid steps so the batch can shard over both TCs (v7x).
    multi = [d for d in fitting if d <= max(1, n // 2)]
    return max(multi) if multi else max(fitting)


def lambda_layer_forward(x: jax.Array, planes: int, batch_tile=None) -> jax.Array:
    """Pallas TPU equivalent of the ResNet option-A shortcut LambdaLayer."""
    n, c, h, w = x.shape
    pad = planes // 4
    c_out = c + 2 * pad

    if (h % 2) or (w % 2):
        # TODO(synk): fast path assumes even H/W (always true for the
        # ResNet-CIFAR shortcut); odd spatial dims use the plain JAX path.
        return lambda_layer_reference(x, planes)

    h_out, w_out = h // 2, w // 2
    hw, hw_out = h * w, h_out * w_out
    dtype = x.dtype
    item = jnp.dtype(dtype).itemsize
    sub = _sublane_tile(dtype)

    # Resident selection-matrix footprint (double-buffered, constant index map).
    s_bytes = 2 * _round_up(hw, sub) * _round_up(hw_out, 128) * item
    if s_bytes > 16 * 1024 * 1024:
        # TODO(synk): for very large spatial extents the selection matrix no
        # longer fits comfortably in VMEM; use the plain JAX path.
        return lambda_layer_reference(x, planes)

    vmem_limit = 32 * 1024 * 1024                      # <= v7x physical 64 MiB
    io_budget = max(4 * 1024 * 1024, 24 * 1024 * 1024 - s_bytes)

    if batch_tile is None:
        batch_tile = _pick_batch_tile(n, c, c_out, hw, hw_out, dtype, io_budget)
    assert n % batch_tile == 0, "batch_tile must divide the batch size"
    grid_steps = n // batch_tile

    # Selection matrix: output lane j = (h2, w2) pulls input lane 2*h2*w + 2*w2.
    j = jnp.arange(hw_out)
    src = 2 * (j // w_out) * w + 2 * (j % w_out)
    sel = (jnp.arange(hw)[:, None] == src[None, :]).astype(dtype)

    x2d = x.reshape(n * c, hw)                         # free: NCHW is contiguous
    rows_in = batch_tile * c
    rows_out = batch_tile * c_out

    kernel = functools.partial(_shortcut_kernel, bt=batch_tile, c=c, pad=pad,
                               hw_out=hw_out)

    out2d = pl.pallas_call(
        kernel,
        out_shape=jax.ShapeDtypeStruct((n * c_out, hw_out), dtype),
        grid_spec=pltpu.PrefetchScalarGridSpec(
            num_scalar_prefetch=0,
            grid=(grid_steps,),
            in_specs=[
                pl.BlockSpec((rows_in, hw), lambda i: (i, 0)),
                # Constant block index -> fetched once, resident across steps.
                pl.BlockSpec((hw, hw_out), lambda i: (0, 0)),
            ],
            out_specs=pl.BlockSpec((rows_out, hw_out), lambda i: (i, 0)),
        ),
        compiler_params=pltpu.CompilerParams(
            dimension_semantics=("parallel",),         # shard batch over 2 TCs
            vmem_limit_bytes=vmem_limit,
        ),
    )(x2d, sel)

    # Free reshape back to NCHW.
    return out2d.reshape(n, c_out, h_out, w_out)


if __name__ == "__main__":
    key = jax.random.PRNGKey(0)

    # Small shapes consistent with the module's canonical use.
    N, C, H, W = 2, 4, 16, 16
    planes = 2 * C                      # option-A shortcut doubles the channels
    x = jax.random.normal(key, (N, C, H, W), dtype=jnp.float32)

    ref = lambda_layer_reference(x, planes)
    out = jax.block_until_ready(lambda_layer_forward(x, planes))
    assert out.shape == ref.shape, (out.shape, ref.shape)
    assert jnp.allclose(out, ref, rtol=1e-6, atol=1e-6), "mismatch vs reference"

    # Second config: channel count divisible by the sublane tile exercises the
    # multi-step (megacore-friendly) grid path.
    x2 = jax.random.normal(jax.random.PRNGKey(0), (2, 8, 16, 16), dtype=jnp.float32)
    ref2 = lambda_layer_reference(x2, 16)
    out2 = jax.block_until_ready(lambda_layer_forward(x2, 16))
    assert out2.shape == ref2.shape, (out2.shape, ref2.shape)
    assert jnp.allclose(out2, ref2, rtol=1e-6, atol=1e-6), "mismatch (multi-step)"

    print("KERNEL_OK")
</pallas_src>

<mosaic_0001>
module attributes {stable_mosaic.version = 11 : i64} {
  func.func @_shortcut_kernel(%arg0: i32, %arg1: memref<8x256xf32, #tpu.memory_space<vmem>>, %arg2: memref<256x64xf32, #tpu.memory_space<vmem>>, %arg3: memref<16x64xf32, #tpu.memory_space<vmem>>) attributes {dimension_semantics = [#tpu.dimension_semantics<parallel>], iteration_bounds = array<i64: 1>, scalar_prefetch = 0 : i64, scratch_operands = 0 : i64, tpu.core_type = #tpu.core_type<tc>, window_params = [{transform_indices = @transform_0, window_bounds = array<i64: 8, 256>}, {pipeline_mode = #tpu.pipeline_mode<synchronous>, transform_indices = @transform_1, window_bounds = array<i64: 256, 64>}, {transform_indices = @transform_2, window_bounds = array<i64: 16, 64>}]} {
    %c0 = arith.constant 0 : index
    %c0_0 = arith.constant 0 : index
    %0 = vector.load %arg1[%c0, %c0_0] : memref<8x256xf32, #tpu.memory_space<vmem>>, vector<8x256xf32>
    %c0_1 = arith.constant 0 : index
    %c0_2 = arith.constant 0 : index
    %1 = vector.load %arg2[%c0_1, %c0_2] : memref<256x64xf32, #tpu.memory_space<vmem>>, vector<256x64xf32>
    %cst = arith.constant dense<0.000000e+00> : vector<8x64xf32>
    %2 = tpu.matmul %0, %1, %cst {dimension_numbers = #tpu.dot_dimension_numbers<[1], [0], [0], [1], [0, 0, 1, 1], [], []>, precision = #tpu.contract_precision<fp32>} : vector<8x256xf32>, vector<256x64xf32>, vector<8x64xf32> -> vector<8x64xf32>
    %cst_3 = arith.constant 0.000000e+00 : f32
    %3 = vector.broadcast %cst_3 : f32 to vector<2x64xf32>
    %c0_4 = arith.constant 0 : index
    %c0_5 = arith.constant 0 : index
    %4 = vector.load %arg3[%c0_4, %c0_5] : memref<16x64xf32, #tpu.memory_space<vmem>>, vector<2x64xf32>
    tpu.vector_store %arg3[%c0_4, %c0_5], %3 {strides = array<i32>} : memref<16x64xf32, #tpu.memory_space<vmem>>, vector<2x64xf32>,
    %5 = vector.extract_strided_slice %2 {offsets = [0, 0], sizes = [4, 64], strides = [1, 1]} : vector<8x64xf32> to vector<4x64xf32>
    %c2 = arith.constant 2 : index
    %c0_6 = arith.constant 0 : index
    %6 = vector.load %arg3[%c2, %c0_6] : memref<16x64xf32, #tpu.memory_space<vmem>>, vector<4x64xf32>
    tpu.vector_store %arg3[%c2, %c0_6], %5 {strides = array<i32>} : memref<16x64xf32, #tpu.memory_space<vmem>>, vector<4x64xf32>,
    %c6 = arith.constant 6 : index
    %c0_7 = arith.constant 0 : index
    %7 = vector.load %arg3[%c6, %c0_7] : memref<16x64xf32, #tpu.memory_space<vmem>>, vector<2x64xf32>
    tpu.vector_store %arg3[%c6, %c0_7], %3 {strides = array<i32>} : memref<16x64xf32, #tpu.memory_space<vmem>>, vector<2x64xf32>,
    %c8 = arith.constant 8 : index
    %c0_8 = arith.constant 0 : index
    %8 = vector.load %arg3[%c8, %c0_8] : memref<16x64xf32, #tpu.memory_space<vmem>>, vector<2x64xf32>
    tpu.vector_store %arg3[%c8, %c0_8], %3 {strides = array<i32>} : memref<16x64xf32, #tpu.memory_space<vmem>>, vector<2x64xf32>,
    %9 = vector.extract_strided_slice %2 {offsets = [4, 0], sizes = [4, 64], strides = [1, 1]} : vector<8x64xf32> to vector<4x64xf32>
    %c10 = arith.constant 10 : index
    %c0_9 = arith.constant 0 : index
    %10 = vector.load %arg3[%c10, %c0_9] : memref<16x64xf32, #tpu.memory_space<vmem>>, vector<4x64xf32>
    tpu.vector_store %arg3[%c10, %c0_9], %9 {strides = array<i32>} : memref<16x64xf32, #tpu.memory_space<vmem>>, vector<4x64xf32>,
    %c14 = arith.constant 14 : index
    %c0_10 = arith.constant 0 : index
    %11 = vector.load %arg3[%c14, %c0_10] : memref<16x64xf32, #tpu.memory_space<vmem>>, vector<2x64xf32>
    tpu.vector_store %arg3[%c14, %c0_10], %3 {strides = array<i32>} : memref<16x64xf32, #tpu.memory_space<vmem>>, vector<2x64xf32>,
    return
  }
  func.func @transform_0(%arg0: i32) -> (i32, i32) {
    %c0_i32 = arith.constant 0 : i32
    %c0_i32_0 = arith.constant 0 : i32
    return %arg0, %c0_i32 : i32, i32
  }
  func.func @transform_1(%arg0: i32) -> (i32, i32) {
    %c0_i32 = arith.constant 0 : i32
    %c0_i32_0 = arith.constant 0 : i32
    %c0_i32_1 = arith.constant 0 : i32
    return %c0_i32, %c0_i32_0 : i32, i32
  }
  func.func @transform_2(%arg0: i32) -> (i32, i32) {
    %c0_i32 = arith.constant 0 : i32
    %c0_i32_0 = arith.constant 0 : i32
    return %arg0, %c0_i32 : i32, i32
  }
}

</mosaic_0001>

<bundles_post_ra>
// kernel: tpu_custom_call.1
= control target key start
LH: loop header
LB: loop body
LE: loop exit
PB: predicated region body
PF: predicated region fallthrough
CT: control target
= control target key end

     0   :  { %s1894_s0 = inlined_call_operand.vmem [shape: f32[8,256], index: 0, kind: input, shape index: {}]   ;;  %s1895_s1 = inlined_call_operand.vmem [shape: f32[256,64], index: 1, kind: input, shape index: {}]   ;;  %s1896_s2 = inlined_call_operand.hbm [shape: f32[16,64], index: 2, kind: output, shape index: {}]  }
   0x1   :  { %v30_v0 = vld [vmem:[%s1895_s1 + $0x80] sm:$0xff]  ;;  %v31_v1 = vld [vmem:[%s1895_s1 + $0x88] sm:$0xff]  ;;  %v32_v7 = vld [vmem:[%s1895_s1 + $0x90] sm:$0xff] }
   0x2   :  { %v14_v2 = vld [vmem:[%s1895_s1] sm:$0xff]  ;;  %v95_v3 = vand.u32 4294901760, %v30_v0  ;;  %v98_v4 = vand.u32 4294901760, %v31_v1  ;;  %v15_v5 = vld [vmem:[%s1895_s1 + $0x8] sm:$0xff]  ;;  %v33_v8 = vld [vmem:[%s1895_s1 + $0x98] sm:$0xff]  ;;  %v101_v10 = vand.u32 4294901760, %v32_v7 }
   0x3   :  { %v47_v6 = vand.u32 4294901760, %v14_v2  ;;  %v50_v9 = vand.u32 4294901760, %v15_v5  ;;  %v104_v11 = vand.u32 4294901760, %v33_v8  ;;  %v16_v12 = vld [vmem:[%s1895_s1 + $0x10] sm:$0xff]  ;;  %v17_v13 = vld [vmem:[%s1895_s1 + $0x18] sm:$0xff]  ;;  %v34_v18 = vld [vmem:[%s1895_s1 + $0xa0] sm:$0xff] }
   0x4   :  { %v1406_v14 = vpack.c.bf16 %v98_v4, %v95_v3  ;;  %v53_v16 = vand.u32 4294901760, %v16_v12  ;;  %v56_v17 = vand.u32 4294901760, %v17_v13  ;;  %v35_v19 = vld [vmem:[%s1895_s1 + $0xa8] sm:$0xff]  ;;  %v18_v23 = vld [vmem:[%s1895_s1 + $0x20] sm:$0xff]  ;;  %v1429_v25 = vsub.f32 %v32_v7, %v101_v10  ;;  %v36_v37 = vld [vmem:[%s1895_s1 + $0xb0] sm:$0xff] }
   0x5   :  { %v1408_v15 = vsub.f32 %v14_v2, %v47_v6  ;;  %v1416_v20 = vpack.c.bf16 %v50_v9, %v47_v6  ;;  %v1418_v21 = vsub.f32 %v15_v5, %v50_v9  ;;  %v1420_v22 = vpack.c.bf16 %v104_v11, %v101_v10  ;;  %v19_v24 = vld [vmem:[%s1895_s1 + $0x28] sm:$0xff]  ;;  %v37_v42 = vld [vmem:[%s1895_s1 + $0xb8] sm:$0xff]  ;;  %v20_v55 = vld [vmem:[%s1895_s1 + $0x30] sm:$0xff] }
   0x6   :  { %1144 = vmatprep.subr.bf16.mxu0 %v1406_v14  ;;  %v1431_v26 = vsub.f32 %v33_v8, %v104_v11  ;;  %v1433_v27 = vpack.c.bf16 %v56_v17, %v53_v16  ;;  %v1435_v28 = vsub.f32 %v16_v12, %v53_v16  ;;  %v107_v29 = vand.u32 4294901760, %v34_v18  ;;  %v21_v56 = vld [vmem:[%s1895_s1 + $0x38] sm:$0xff] }
   0x7   :  { %1146 = vmatpush3.bf16.msra.mxu0 %v1416_v20  ;;  %v110_v30 = vand.u32 4294901760, %v35_v19  ;;  %v1438_v31 = vsub.f32 %v30_v0, %v95_v3  ;;  %v1440_v32 = vsub.f32 %v31_v1, %v98_v4  ;;  %v59_v33 = vand.u32 4294901760, %v18_v23 }
   0x8   :  { %1148 = vmatprep.subr.bf16.mxu0 %v1420_v22  ;;  %v62_v34 = vand.u32 4294901760, %v19_v24  ;;  %v1913_v35 = vand.u32 4294901760, %v1408_v15  ;;  %v1912_v36 = vand.u32 4294901760, %v1418_v21  ;;  %v1448_v38 = vsub.f32 %v17_v13, %v56_v17 }
   0x9   :  { %v1450_v39 = vpack.c.bf16 %v110_v30, %v107_v29  ;;  %v1452_v40 = vsub.f32 %v34_v18, %v107_v29  ;;  %v1918_v41 = vand.u32 4294901760, %v1438_v31  ;;  %v1458_v43 = vsub.f32 %v35_v19, %v110_v30 }
   0xa   :  { %v1915_v44 = vand.u32 4294901760, %v1440_v32  ;;  %v1461_v45 = vpack.c.bf16 %v62_v34, %v59_v33  ;;  %v1463_v46 = vsub.f32 %v18_v23, %v59_v33  ;;  %v162_v48 = vsub.f32 %v1408_v15, %v1913_v35 }
   0xb   :  { %1150 = vmatpush3.bf16.msra.mxu0 %v1433_v27  ;;  %v274_v47 = vsub.f32 %v1438_v31, %v1918_v41  ;;  %v169_v49 = vsub.f32 %v1418_v21, %v1912_v36  ;;  %v113_v50 = vand.u32 4294901760, %v36_v37  ;;  %v116_v52 = vand.u32 4294901760, %v37_v42 }
   0xc   :  { %1152 = vmatprep.subr.bf16.mxu0 %v1450_v39  ;;  %v281_v51 = vsub.f32 %v1440_v32, %v1915_v44  ;;  %v1910_v53 = vand.u32 4294901760, %v1429_v25  ;;  %v1909_v54 = vand.u32 4294901760, %v1431_v26  ;;  %v1487_v58 = vsub.f32 %v19_v24, %v62_v34 }
   0xd   :  { %v275_v57 = vand.u32 4294901760, %v274_v47  ;;  %v163_v59 = vand.u32 4294901760, %v162_v48  ;;  %v170_v60 = vand.u32 4294901760, %v169_v49 }
   0xe   :  { %7 = vsyncpa [#allocation3], 0  ;;  %v282_v61 = vand.u32 4294901760, %v281_v51  ;;  %v1489_v62 = vpack.c.bf16 %v116_v52, %v113_v50  ;;  %v1491_v63 = vsub.f32 %v36_v37, %v113_v50  ;;  %v288_v0 = vsub.f32 %v1429_v25, %v1910_v53  ;;  %v38_v5 = vld [vmem:[%s1895_s1 + $0xc0] sm:$0xff]  ;;  %v39_v6 = vld [vmem:[%s1895_s1 + $0xc8] sm:$0xff] }
   0xf   :  { %1154 = vmatpush3.bf16.msra.mxu0 %v1461_v45  ;;  %v1177_v1 = vpack.c.bf16 %v170_v60, %v163_v59  ;;  %v295_v2 = vsub.f32 %v1431_v26, %v1909_v54  ;;  %v65_v3 = vand.u32 4294901760, %v20_v55  ;;  %v68_v4 = vand.u32 4294901760, %v21_v56  ;;  %v22_v11 = vld [vmem:[%s1895_s1 + $0x40] sm:$0xff]  ;;  %v23_v29 = vld [vmem:[%s1895_s1 + $0x48] sm:$0xff] }
  0x10   :  { %v1175_v7 = vpack.c.bf16 %v282_v61, %v275_v57  ;;  %1156 = vmatprep.subr.bf16.mxu0 %v1489_v62  ;;  %v289_v8 = vand.u32 4294901760, %v288_v0  ;;  %v1908_v9 = vand.u32 4294901760, %v1435_v28  ;;  %v1905_v10 = vand.u32 4294901760, %v1448_v38  ;;  %v41_v57 = vld [vmem:[%s1895_s1 + $0xd8] sm:$0xff] }
  0x11   :  { %v1512_v12 = vsub.f32 %v37_v42, %v116_v52  ;;  %v296_v13 = vand.u32 4294901760, %v295_v2  ;;  %v1514_v16 = vpack.c.bf16 %v68_v4, %v65_v3  ;;  %v1516_v17 = vsub.f32 %v20_v55, %v65_v3 }
  0x12   :  { %1176 = vmatprep.subr.bf16.mxu1 %v1175_v7  ;;  %v176_v18 = vsub.f32 %v1435_v28, %v1908_v9  ;;  %v183_v19 = vsub.f32 %v1448_v38, %v1905_v10  ;;  %v119_v23 = vand.u32 4294901760, %v38_v5  ;;  %v122_v24 = vand.u32 4294901760, %v39_v6 }
  0x13   :  { %1178 = vmatpush3.bf16.msra.mxu1 %v1177_v1  ;;  %v1179_v30 = vpack.c.bf16 %v296_v13, %v289_v8  ;;  %1158 = vmatpush3.bf16.msra.mxu0 %v1514_v16  ;;  %v1903_v33 = vand.u32 4294901760, %v1452_v40  ;;  %v1902_v34 = vand.u32 4294901760, %v1458_v43  ;;  %v71_v37 = vand.u32 4294901760, %v22_v11  ;;  %v24_v1 = vld [vmem:[%s1895_s1 + $0x50] sm:$0xff] }
  0x14   :  { %v1530_v42 = vsub.f32 %v21_v56, %v68_v4  ;;  %v177_v47 = vand.u32 4294901760, %v176_v18  ;;  %v184_v48 = vand.u32 4294901760, %v183_v19  ;;  %v1532_v49 = vpack.c.bf16 %v122_v24, %v119_v23  ;;  %v40_v56 = vld [vmem:[%s1895_s1 + $0xd0] sm:$0xff]  ;;  %v25_v18 = vld [vmem:[%s1895_s1 + $0x58] sm:$0xff] }
  0x15   :  { %1180 = vmatprep.subr.bf16.mxu1 %v1179_v30  ;;  %v1534_v50 = vsub.f32 %v38_v5, %v119_v23  ;;  %v302_v51 = vsub.f32 %v1452_v40, %v1903_v33  ;;  %v309_v52 = vsub.f32 %v1458_v43, %v1902_v34  ;;  %v74_v55 = vand.u32 4294901760, %v23_v29 }
  0x16   :  { %v1181_v59 = vpack.c.bf16 %v184_v48, %v177_v47  ;;  %1160 = vmatprep.subr.bf16.mxu0 %v1532_v49  ;;  %v1549_v60 = vsub.f32 %v39_v6, %v122_v24  ;;  %v1900_v61 = vand.u32 4294901760, %v1463_v46  ;;  %v1899_v0 = vand.u32 4294901760, %v1487_v58 }
  0x17   :  { %v303_v2 = vand.u32 4294901760, %v302_v51  ;;  %v310_v3 = vand.u32 4294901760, %v309_v52  ;;  %v1556_v4 = vpack.c.bf16 %v74_v55, %v71_v37  ;;  %v1558_v5 = vsub.f32 %v22_v11, %v71_v37 }
  0x18   :  { %1182 = vmatpush3.bf16.msra.mxu1 %v1181_v59  ;;  %v190_v6 = vsub.f32 %v1463_v46, %v1900_v61  ;;  %v197_v7 = vsub.f32 %v1487_v58, %v1899_v0  ;;  %v125_v8 = vand.u32 4294901760, %v40_v56  ;;  %v128_v13 = vand.u32 4294901760, %v41_v57 }
  0x19   :  { %v1183_v19 = vpack.c.bf16 %v310_v3, %v303_v2  ;;  %1162 = vmatpush3.bf16.msra.mxu0 %v1556_v4  ;;  %v1898_v11 = vand.u32 4294901760, %v1491_v63  ;;  %v1897_v23 = vand.u32 4294901760, %v1512_v12  ;;  %v77_v24 = vand.u32 4294901760, %v24_v1 }
  0x1a   :  { %v1572_v30 = vsub.f32 %v23_v29, %v74_v55  ;;  %v191_v37 = vand.u32 4294901760, %v190_v6  ;;  %v198_v47 = vand.u32 4294901760, %v197_v7  ;;  %v1574_v48 = vpack.c.bf16 %v128_v13, %v125_v8  ;;  %v42_v29 = vld [vmem:[%s1895_s1 + $0xe0] sm:$0xff]  ;;  %v43_v55 = vld [vmem:[%s1895_s1 + $0xe8] sm:$0xff] }
  0x1b   :  { %1184 = vmatprep.subr.bf16.mxu1 %v1183_v19  ;;  %v1576_v51 = vsub.f32 %v40_v56, %v125_v8  ;;  %v316_v52 = vsub.f32 %v1491_v63, %v1898_v11  ;;  %v323_v59 = vsub.f32 %v1512_v12, %v1897_v23  ;;  %v80_v2 = vand.u32 4294901760, %v25_v18  ;;  %v26_v8 = vld [vmem:[%s1895_s1 + $0x60] sm:$0xff] }
  0x1c   :  { %v1185_v3 = vpack.c.bf16 %v198_v47, %v191_v37  ;;  %1164 = vmatprep.subr.bf16.mxu0 %v1574_v48  ;;  %v1591_v56 = vsub.f32 %v41_v57, %v128_v13  ;;  %v1901_v6 = vand.u32 4294901760, %v1516_v17  ;;  %v1904_v7 = vand.u32 4294901760, %v1530_v42 }
  0x1d   :  { %v317_v19 = vand.u32 4294901760, %v316_v52  ;;  %v324_v23 = vand.u32 4294901760, %v323_v59  ;;  %v1598_v11 = vpack.c.bf16 %v80_v2, %v77_v24  ;;  %v1600_v0 = vsub.f32 %v24_v1, %v77_v24  ;;  %v27_v52 = vld [vmem:[%s1895_s1 + $0x68] sm:$0xff] }
  0x1e   :  { %1186 = vmatpush3.bf16.msra.mxu1 %v1185_v3  ;;  %v204_v57 = vsub.f32 %v1516_v17, %v1901_v6  ;;  %v211_v13 = vsub.f32 %v1530_v42, %v1904_v7  ;;  %v131_v37 = vand.u32 4294901760, %v42_v29  ;;  %v134_v47 = vand.u32 4294901760, %v43_v55 }
  0x1f   :  { %1942 = vst [vmem:[#allocation5_spill] sm:$0xff] %v1598_v11  ;;  %v1187_v59 = vpack.c.bf16 %v324_v23, %v317_v19  ;;  %1166 = vmatpush3.bf16.msra.mxu0 %v1598_v11  ;;  %v1907_v1 = vand.u32 4294901760, %v1534_v50  ;;  %v1906_v24 = vand.u32 4294901760, %v1549_v60  ;;  %v83_v3 = vand.u32 4294901760, %v26_v8 }
  0x20   :  { %v1614_v61 = vsub.f32 %v25_v18, %v80_v2  ;;  %v205_v6 = vand.u32 4294901760, %v204_v57  ;;  %v212_v34 = vand.u32 4294901760, %v211_v13  ;;  %v1616_v33 = vpack.c.bf16 %v134_v47, %v131_v37  ;;  %v44_v18 = vld [vmem:[%s1895_s1 + $0xf0] sm:$0xff]  ;;  %v45_v2 = vld [vmem:[%s1895_s1 + $0xf8] sm:$0xff] }
  0x21   :  { %1188 = vmatprep.subr.bf16.mxu1 %v1187_v59  ;;  %v1618_v7 = vsub.f32 %v42_v29, %v131_v37  ;;  %v330_v23 = vsub.f32 %v1534_v50, %v1907_v1  ;;  %v337_v19 = vsub.f32 %v1549_v60, %v1906_v24  ;;  %v86_v10 = vand.u32 4294901760, %v27_v52  ;;  %v28_v59 = vld [vmem:[%s1895_s1 + $0x70] sm:$0xff] }
  0x22   :  { %1943 = vst [vmem:[#allocation6_spill] sm:$0xff] %v1616_v33  ;;  %v1189_v57 = vpack.c.bf16 %v212_v34, %v205_v6  ;;  %1168 = vmatprep.subr.bf16.mxu0 %v1616_v33  ;;  %v1633_v29 = vsub.f32 %v43_v55, %v134_v47  ;;  %v1911_v13 = vand.u32 4294901760, %v1558_v5  ;;  %v1914_v37 = vand.u32 4294901760, %v1572_v30 }
  0x23   :  { %v331_v24 = vand.u32 4294901760, %v330_v23  ;;  %v338_v1 = vand.u32 4294901760, %v337_v19  ;;  %v1640_v9 = vpack.c.bf16 %v86_v10, %v83_v3  ;;  %v1642_v54 = vsub.f32 %v26_v8, %v83_v3  ;;  %v29_v23 = vld [vmem:[%s1895_s1 + $0x78] sm:$0xff] }
  0x24   :  { %1190 = vmatpush3.bf16.msra.mxu1 %v1189_v57  ;;  %v218_v34 = vsub.f32 %v1558_v5, %v1911_v13  ;;  %v225_v55 = vsub.f32 %v1572_v30, %v1914_v37  ;;  %v137_v6 = vand.u32 4294901760, %v44_v18  ;;  %v140_v47 = vand.u32 4294901760, %v45_v2 }
  0x25   :  { %1944 = vst [vmem:[#allocation7_spill] sm:$0xff] %v1640_v9  ;;  %v1191_v19 = vpack.c.bf16 %v338_v1, %v331_v24  ;;  %1170 = vmatpush3.bf16.msra.mxu0 %v1640_v9  ;;  %v1917_v8 = vand.u32 4294901760, %v1576_v51  ;;  %v1916_v3 = vand.u32 4294901760, %v1591_v56  ;;  %v89_v57 = vand.u32 4294901760, %v28_v59 }
  0x26   :  { %v1656_v53 = vsub.f32 %v27_v52, %v86_v10  ;;  %v219_v13 = vand.u32 4294901760, %v218_v34  ;;  %v226_v36 = vand.u32 4294901760, %v225_v55  ;;  %v1658_v35 = vpack.c.bf16 %v140_v47, %v137_v6  ;;  %v13_v10 = vld [vmem:[%s1894_s0 + $0x8] sm:$0xff] }
  0x27   :  { %1192 = vmatprep.subr.bf16.mxu1 %v1191_v19  ;;  %v1660_v37 = vsub.f32 %v44_v18, %v137_v6  ;;  %v344_v1 = vsub.f32 %v1576_v51, %v1917_v8  ;;  %v351_v24 = vsub.f32 %v1591_v56, %v1916_v3  ;;  %v92_v44 = vand.u32 4294901760, %v29_v23  ;;  %v12_v6 = vld [vmem:[%s1894_s0] sm:$0xff]  ;;  %s1364_s0 = smov [#allocation2]  }
  0x28   :  { %1945 = vst [vmem:[#allocation8_spill] sm:$0xff] %v1658_v35  ;;  %v1193_v52 = vpack.c.bf16 %v226_v36, %v219_v13  ;;  %1172 = vmatprep.subr.bf16.mxu0 %v1658_v35  ;;  %v1672_v34 = vsub.f32 %v45_v2, %v140_v47  ;;  %v1921_v18 = vand.u32 4294901760, %v1600_v0  ;;  %v1922_v55 = vand.u32 4294901760, %v1614_v61  ;;  %s922_s20 = sshll.u32 %s1364_s0, 4  ;;  %s923_s20 = int_to_ptr.vmem [resolvable:$true] %s922_s20 }
  0x29   :  { %v345_v19 = vand.u32 4294901760, %v344_v1  ;;  %v352_v3 = vand.u32 4294901760, %v351_v24  ;;  %v1679_v8 = vpack.c.bf16 %v92_v44, %v89_v57  ;;  %v1681_v41 = vsub.f32 %v28_v59, %v89_v57  ;;  %s1339_s21 = scalar_lea.vmem %s923_s20, 256  ;;  %p1344_p1 = scmp.lt.s32.totalorder %s923_s20, %s923_s20 }
  0x2a   :  { %1194 = vmatpush3.bf16.msra.mxu1 %v1193_v52  ;;  %v232_v36 = vsub.f32 %v1600_v0, %v1921_v18  ;;  %v239_v2 = vsub.f32 %v1614_v61, %v1922_v55  ;;  %v1689_v13 = vand.u32 4294901760, %v13_v10  ;;  %v1925_v47 = vand.u32 4294901760, %v1618_v7  ;;  %p1340_p0 = scmp.ne.s32.totalorder %s923_s20, %s1339_s21  ;;  %p1345_p2 = scmp.lt.s32.totalorder %s1339_s21, %s1339_s21 }
  0x2b   :  { %1946 = vst [vmem:[#allocation9_spill] sm:$0xff] %v1679_v8  ;;  %v1195_v35 = vpack.c.bf16 %v352_v3, %v345_v19  ;;  %1174 = vmatpush3.bf16.msra.mxu0 %v1679_v8  ;;  %v1931_v1 = vand.u32 4294901760, %v1633_v29  ;;  %v1207_v59 = vpack.c.bf16 %v1440_v32, %v1438_v31  ;;  %v1696_v57 = vand.u32 4294901760, %v12_v6 }
  0x2c   :  { %1947 = vst [vmem:[#allocation10_spill] sm:$0xff] %v1689_v13  ;;  %v233_v24 = vand.u32 4294901760, %v232_v36  ;;  %v240_v52 = vand.u32 4294901760, %v239_v2  ;;  %v1699_v18 = vsub.f32 %v13_v10, %v1689_v13  ;;  %v358_v55 = vsub.f32 %v1618_v7, %v1925_v47  ;;  %383 = vmatprep.mubr.f32.mxu1 %v1689_v13  ;;  %p1346_p3 = por %p1345_p2, %p1344_p1 }
  0x2d   :  { %1196 = vmatprep.subr.bf16.mxu1 %v1195_v35  ;;  %v365_v3 = vsub.f32 %v1633_v29, %v1931_v1  ;;  %1208 = vmatprep.subr.bf16.mxu0 %v1207_v59  ;;  %v1709_v19 = vsub.f32 %v12_v6, %v1696_v57  ;;  %v1930_v36 = vand.u32 4294901760, %v1642_v54  ;;  %v1932_v10 = vand.u32 4294901760, %v1656_v53 }
  0x2e   :  { %v1713_v2 = vsub.f32 %v29_v23, %v92_v44  ;;  %v1197_v8 = vpack.c.bf16 %v240_v52, %v233_v24  ;;  %v1933_v47 = vand.u32 4294901760, %v1699_v18  ;;  %v359_v9 = vand.u32 4294901760, %v358_v55  ;;  %p1347_p4 = pnand %p1346_p3, %p1340_p0 }
  0x2f   :  { %v366_v13 = vand.u32 4294901760, %v365_v3  ;;  %v150_v35 = vand.u32 4294901760, %v1709_v19  ;;  %v246_v59 = vsub.f32 %v1642_v54, %v1930_v36  ;;  %v253_v6 = vsub.f32 %v1656_v53, %v1932_v10 }
  0x30   :  { %1198 = vmatpush3.bf16.msra.mxu1 %v1197_v8  ;;  %v145_v44 = vsub.f32 %v1699_v18, %v1933_v47  ;;  %v1209_v23 = vpack.c.bf16 %v1418_v21, %v1408_v15  ;;  %v1938_v55 = vand.u32 4294901760, %v1660_v37  ;;  %v1941_v24 = vand.u32 4294901760, %v1672_v34 }
  0x31   :  { %v1199_v52 = vpack.c.bf16 %v366_v13, %v359_v9  ;;  %v151_v3 = vsub.f32 %v1709_v19, %v150_v35  ;;  %v247_v36 = vand.u32 4294901760, %v246_v59  ;;  %v254_v1 = vand.u32 4294901760, %v253_v6 }
  0x32   :  { %v146_v10 = vand.u32 4294901760, %v145_v44  ;;  %v372_v8 = vsub.f32 %v1660_v37, %v1938_v55  ;;  %v379_v47 = vsub.f32 %v1672_v34, %v1941_v24  ;;  %v1940_v33 = vand.u32 4294901760, %v1681_v41 }
  0x33   :  { %1200 = vmatprep.subr.bf16.mxu1 %v1199_v52  ;;  %v152_v11 = vand.u32 4294901760, %v151_v3  ;;  %v1201_v9 = vpack.c.bf16 %v254_v1, %v247_v36  ;;  %v1211_v13 = vpack.c.bf16 %v1431_v26, %v1429_v25  ;;  %v1939_v59 = vand.u32 4294901760, %v1713_v2 }
  0x34   :  { %147 = vmatprep.mubr.f32.mxu0 %v146_v10  ;;  %v373_v6 = vand.u32 4294901760, %v372_v8  ;;  %v380_v44 = vand.u32 4294901760, %v379_v47  ;;  %v260_v55 = vsub.f32 %v1681_v41, %v1940_v33  ;;  %v1213_v3 = vpack.c.bf16 %v1448_v38, %v1435_v28 }
  0x35   :  { %153 = vmatmul.mubr.f32.vlgmr.msra.gmra.mrb[0].mxu0 %v152_v11  ;;  %1202 = vmatpush3.bf16.msra.mxu1 %v1201_v9  ;;  %v267_v52 = vsub.f32 %v1713_v2, %v1939_v59  ;;  %v1215_v10 = vpack.c.bf16 %v1458_v43, %v1452_v40  ;;  %v1217_v11 = vpack.c.bf16 %v1487_v58, %v1463_v46  ;;  %v1949_v9 = vand.u32 4294901760, %v1440_v32 }
  0x36   :  { %1210 = vmatpush3.bf16.msra.mxu0 %v1209_v23  ;;  %v1203_v1 = vpack.c.bf16 %v380_v44, %v373_v6  ;;  %v261_v36 = vand.u32 4294901760, %v260_v55  ;;  %520 = vmatprep.mubr.f32.mxu0 %v1699_v18  ;;  %v1219_v8 = vpack.c.bf16 %v1512_v12, %v1491_v63  ;;  %v1948_v55 = vand.u32 4294901760, %v1438_v31 }
  0x37   :  { %1212 = vmatprep.subr.bf16.mxu0 %v1211_v13  ;;  %v268_v47 = vand.u32 4294901760, %v267_v52  ;;  %v1950_v44 = vand.u32 4294901760, %v1408_v15  ;;  %v1951_v13 = vand.u32 4294901760, %v1418_v21  ;;  %v1952_v59 = vand.u32 4294901760, %v1429_v25 }
  0x38   :  { %1204 = vmatprep.subr.bf16.mxu1 %v1203_v1  ;;  %v1271_v6 = vpack.c.bf16 %v1949_v9, %v1948_v55  ;;  %v1953_v1 = vand.u32 4294901760, %v1431_v26  ;;  %v1954_v24 = vand.u32 4294901760, %v1435_v28  ;;  %v1956_v31 = vand.u32 4294901760, %v1452_v40 }
  0x39   :  { %v1205_v23 = vpack.c.bf16 %v268_v47, %v261_v36  ;;  %v1273_v52 = vpack.c.bf16 %v1951_v13, %v1950_v44  ;;  %v1955_v36 = vand.u32 4294901760, %v1448_v38  ;;  %v1957_v32 = vand.u32 4294901760, %v1458_v43  ;;  %v1972_v13 = vld [vmem:[#allocation7_spill] sm:$0xff] }
  0x3a   :  { %v1275_v33 = vpack.c.bf16 %v1953_v1, %v1952_v59  ;;  %1214 = vmatpush3.bf16.msra.mxu0 %v1213_v3  ;;  %v1958_v15 = vand.u32 4294901760, %v1463_v46  ;;  %v1959_v21 = vand.u32 4294901760, %v1487_v58  ;;  %v1960_v25 = vand.u32 4294901760, %v1491_v63  ;;  %v1973_v1 = vld [vmem:[#allocation8_spill] sm:$0xff] }
  0x3b   :  { %v1277_v47 = vpack.c.bf16 %v1955_v36, %v1954_v24  ;;  %v1279_v55 = vpack.c.bf16 %v1957_v32, %v1956_v31  ;;  %v1961_v26 = vand.u32 4294901760, %v1512_v12  ;;  %1206 = vmatpush3.bf16.msra.mxu1 %v1205_v23  ;;  %1216 = vmatprep.subr.bf16.mxu0 %v1215_v10  ;;  %v1962_v28 = vand.u32 4294901760, %v1516_v17  ;;  %v1974_v36 = vld [vmem:[#allocation9_spill] sm:$0xff] }
  0x3c   :  { %v1281_v9 = vpack.c.bf16 %v1959_v21, %v1958_v15  ;;  %v1963_v38 = vand.u32 4294901760, %v1530_v42  ;;  %v1964_v43 = vand.u32 4294901760, %v1534_v50  ;;  %v1965_v24 = vand.u32 4294901760, %v1549_v60  ;;  %1240 = vmatprep.subr.bf16.mxu1 %v1406_v14 }
  0x3d   :  { %v1283_v59 = vpack.c.bf16 %v1961_v26, %v1960_v25  ;;  %v1966_v58 = vand.u32 4294901760, %v1558_v5  ;;  %v1967_v3 = vand.u32 4294901760, %v1572_v30  ;;  %v1221_v12 = vpack.c.bf16 %v1530_v42, %v1516_v17 }
  0x3e   :  { %v1285_v40 = vpack.c.bf16 %v1963_v38, %v1962_v28  ;;  %v1287_v46 = vpack.c.bf16 %v1965_v24, %v1964_v43  ;;  %385 = vmatmul.mubr.f32.vlgmr.msra.gmra.mrb[0].mxu1 %v1696_v57  ;;  %1218 = vmatpush3.bf16.msra.mxu0 %v1217_v11  ;;  %v1223_v10 = vpack.c.bf16 %v1549_v60, %v1534_v50  ;;  %v1968_v23 = vand.u32 4294901760, %v1699_v18  ;;  %v1969_v18 = vld [vmem:[#allocation5_spill] sm:$0xff]  ;;  %v1970_v11 = vld [vmem:[#allocation6_spill] sm:$0xff] }
  0x3f   :  { %v1289_v63 = vpack.c.bf16 %v1967_v3, %v1966_v58  ;;  %1242 = vmatpush3.bf16.msra.mxu1 %v1416_v20  ;;  %1220 = vmatprep.subr.bf16.mxu0 %v1219_v8  ;;  %v1225_v44 = vpack.c.bf16 %v1572_v30, %v1558_v5  ;;  %v1227_v17 = vpack.c.bf16 %v1591_v56, %v1576_v51  ;;  %v1971_v8 = vld [vmem:[#allocation10_spill] sm:$0xff]  ;;  %vm908_vm0 = vcmask 517120  }
  0x40   :  { %1244 = vmatprep.subr.bf16.mxu1 %v1420_v22  ;;  %627 = vmatprep.mubr.f32.mxu1 %v1968_v23  ;;  %v1229_v42 = vpack.c.bf16 %v1614_v61, %v1600_v0  ;;  %v1231_v50 = vpack.c.bf16 %v1633_v29, %v1618_v7  ;;  %v1233_v60 = vpack.c.bf16 %v1656_v53, %v1642_v54  ;;  %vm910_vm1 = vcmask 519168  }
  0x41   :  { %v1235_v5 = vpack.c.bf16 %v1672_v34, %v1660_v37  ;;  %v1237_v30 = vpack.c.bf16 %v1713_v2, %v1681_v41  ;;  %vm914_vm2 = vcmask 523268  }
  0x42   :  { %1222 = vmatpush3.bf16.msra.mxu0 %v1221_v12 }
  0x43   :  { %1246 = vmatpush3.bf16.msra.mxu1 %v1433_v27  ;;  %1224 = vmatprep.subr.bf16.mxu0 %v1223_v10 }
  0x44   :  { %1248 = vmatprep.subr.bf16.mxu1 %v1450_v39 }
  0x46   :  { %1226 = vmatpush3.bf16.msra.mxu0 %v1225_v44 }
  0x47   :  { %1250 = vmatpush3.bf16.msra.mxu1 %v1461_v45  ;;  %1228 = vmatprep.subr.bf16.mxu0 %v1227_v17 }
  0x48   :  { %1252 = vmatprep.subr.bf16.mxu1 %v1489_v62 }
  0x4a   :  { %1230 = vmatpush3.bf16.msra.mxu0 %v1229_v42 }
  0x4b   :  { %1254 = vmatpush3.bf16.msra.mxu1 %v1514_v16  ;;  %1232 = vmatprep.subr.bf16.mxu0 %v1231_v50 }
  0x4c   :  { %1256 = vmatprep.subr.bf16.mxu1 %v1532_v49 }
  0x4e   :  { %1234 = vmatpush3.bf16.msra.mxu0 %v1233_v60 }
  0x4f   :  { %1258 = vmatpush3.bf16.msra.mxu1 %v1556_v4  ;;  %1236 = vmatprep.subr.bf16.mxu0 %v1235_v5 }
  0x50   :  { %1260 = vmatprep.subr.bf16.mxu1 %v1574_v48 }
  0x52   :  { %1238 = vmatpush3.bf16.msra.mxu0 %v1237_v30 }
  0x53   :  { %1262 = vmatpush3.bf16.msra.mxu1 %v1969_v18  ;;  %1272 = vmatprep.subr.bf16.mxu0 %v1271_v6  ;;  %v1976_v6 = vand.u32 4294901760, %v1591_v56 }
  0x54   :  { %1264 = vmatprep.subr.bf16.mxu1 %v1970_v11 }
  0x55   :  { %523 = vmatmul.mubr.f32.vlgmr.msra.gmra.mrb[2].mxu0 %v1709_v19  ;;  %v1977_v19 = vand.u32 4294901760, %v1600_v0 }
  0x56   :  { %1274 = vmatpush3.bf16.msra.mxu0 %v1273_v52  ;;  %797 = vmatprep.mubr.f32.mxu0 %v1971_v8 }
  0x57   :  { %1266 = vmatpush3.bf16.msra.mxu1 %v1972_v13  ;;  %1276 = vmatprep.subr.bf16.mxu0 %v1275_v33  ;;  %v1975_v33 = vand.u32 4294901760, %v1576_v51  ;;  %v1981_v51 = vand.u32 4294901760, %v1642_v54 }
  0x58   :  { %1268 = vmatprep.subr.bf16.mxu1 %v1973_v1 }
  0x5a   :  { %1278 = vmatpush3.bf16.msra.mxu0 %v1277_v47 }
  0x5b   :  { %1270 = vmatpush3.bf16.msra.mxu1 %v1974_v36  ;;  %1280 = vmatprep.subr.bf16.mxu0 %v1279_v55 }
  0x5c   :  { %1304 = vmatprep.subr.bf16.mxu1 %v1406_v14  ;;  %v1291_v14 = vpack.c.bf16 %v1976_v6, %v1975_v33 }
  0x5e   :  { %631 = vmatmul.mubr.f32.vlgmr.msra.gmra.mrb[2].mxu1 %v150_v35  ;;  %1282 = vmatpush3.bf16.msra.mxu0 %v1281_v9 }
  0x5f   :  { %1306 = vmatpush3.bf16.msra.mxu1 %v1416_v20  ;;  %1284 = vmatprep.subr.bf16.mxu0 %v1283_v59  ;;  %v1978_v20 = vand.u32 4294901760, %v1614_v61  ;;  %v1983_v61 = vand.u32 4294901760, %v1660_v37 }
  0x60   :  { %1308 = vmatprep.subr.bf16.mxu1 %v1420_v22  ;;  %901 = vmatprep.mubr.f32.mxu1 %v1971_v8  ;;  %v1979_v22 = vand.u32 4294901760, %v1618_v7  ;;  %v1985_v7 = vand.u32 4294901760, %v1681_v41  ;;  %v1363_v41 = vmov 0.0  }
  0x61   :  { %v1293_v35 = vpack.c.bf16 %v1978_v20, %v1977_v19  ;;  %909 = vst.msk [vmem:[#allocation2] sm:$0x3] %vm908_vm0, %v1363_v41  ;;  %912 = vst.msk [vmem:[#allocation2 + $0x6] sm:$0x3] %vm908_vm0, %v1363_v41 }
  0x62   :  { %1286 = vmatpush3.bf16.msra.mxu0 %v1285_v40  ;;  %913 = vst.msk [vmem:[#allocation2 + $0x8] sm:$0x3] %vm908_vm0, %v1363_v41  ;;  %916 = vst.msk [vmem:[#allocation2 + $0xe] sm:$0x3] %vm908_vm0, %v1363_v41 }
  0x63   :  { %1310 = vmatpush3.bf16.msra.mxu1 %v1433_v27  ;;  %1288 = vmatprep.subr.bf16.mxu0 %v1287_v46  ;;  %v1980_v27 = vand.u32 4294901760, %v1633_v29 }
  0x64   :  { %1312 = vmatprep.subr.bf16.mxu1 %v1450_v39  ;;  %v1982_v39 = vand.u32 4294901760, %v1656_v53 }
  0x65   :  { %v1295_v52 = vpack.c.bf16 %v1980_v27, %v1979_v22 }
  0x66   :  { %1290 = vmatpush3.bf16.msra.mxu0 %v1289_v63  ;;  %v1297_v56 = vpack.c.bf16 %v1982_v39, %v1981_v51 }
  0x67   :  { %1314 = vmatpush3.bf16.msra.mxu1 %v1461_v45  ;;  %1292 = vmatprep.subr.bf16.mxu0 %v1291_v14  ;;  %v1984_v45 = vand.u32 4294901760, %v1672_v34 }
  0x68   :  { %1316 = vmatprep.subr.bf16.mxu1 %v1489_v62  ;;  %v1986_v62 = vand.u32 4294901760, %v1713_v2 }
  0x69   :  { %v1299_v0 = vpack.c.bf16 %v1984_v45, %v1983_v61 }
  0x6a   :  { %1294 = vmatpush3.bf16.msra.mxu0 %v1293_v35  ;;  %v1301_v29 = vpack.c.bf16 %v1986_v62, %v1985_v7 }
  0x6b   :  { %1318 = vmatpush3.bf16.msra.mxu1 %v1514_v16  ;;  %1296 = vmatprep.subr.bf16.mxu0 %v1295_v52 }
  0x6c   :  { %1320 = vmatprep.subr.bf16.mxu1 %v1532_v49 }
  0x6e   :  { %1298 = vmatpush3.bf16.msra.mxu0 %v1297_v56 }
  0x6f   :  { %1322 = vmatpush3.bf16.msra.mxu1 %v1556_v4  ;;  %1300 = vmatprep.subr.bf16.mxu0 %v1299_v0 }
  0x70   :  { %1324 = vmatprep.subr.bf16.mxu1 %v1574_v48 }
  0x72   :  { %1302 = vmatpush3.bf16.msra.mxu0 %v1301_v29 }
  0x73   :  { %1326 = vmatpush3.bf16.msra.mxu1 %v1969_v18 }
  0x74   :  { %1328 = vmatprep.subr.bf16.mxu1 %v1970_v11 }
  0x75   :  { %799 = vmatmul.mubr.f32.vlgmr.msra.gmra.mrb[4].mxu0 %v1696_v57 }
  0x77   :  { %1330 = vmatpush3.bf16.msra.mxu1 %v1972_v13 }
  0x78   :  { %1332 = vmatprep.subr.bf16.mxu1 %v1973_v1 }
  0x7b   :  { %1334 = vmatpush3.bf16.msra.mxu1 %v1974_v36 }
  0x7e   :  { %903 = vmatmul.mubr.f32.vlgmr.msra.gmra.mrb[4].mxu1 %v1696_v57 }
 0x108   :  { %v965_v53 = vpop.f32.mrb[0].mxu0 }
 0x109   :  { %v966_v54 = vpop.f32.mrb[1].mxu0 }
 0x10a   :  { %v967_v16 = vadd.f32 %v966_v54, %v965_v53 }
 0x111   :  { %v1000_v49 = vpop.f32.mrb[0].mxu1 }
 0x112   :  { %v1001_v4 = vpop.f32.mrb[1].mxu1 }
 0x113   :  { %v1002_v48 = vadd.f32 %v1001_v4, %v1000_v49 }
 0x115   :  { %v387_v37 = vadd.f32 %v1002_v48, %v967_v16 }
 0x128   :  { %v1035_v34 = vpop.f32.mrb[2].mxu0 }
 0x129   :  { %v1036_v2 = vpop.f32.mrb[3].mxu0 }
 0x12a   :  { %v1037_v47 = vadd.f32 %v1036_v2, %v1035_v34 }
 0x12c   :  { %v525_v31 = vadd.f32 %v1037_v47, %v387_v37 }
 0x131   :  { %v1070_v32 = vpop.f32.mrb[2].mxu1 }
 0x132   :  { %v1071_v55 = vpop.f32.mrb[3].mxu1 }
 0x133   :  { %v1072_v57 = vadd.f32 %v1071_v55, %v1070_v32 }
 0x135   :  { %v633_v15 = vadd.f32 %v1072_v57, %v525_v31 }
 0x148   :  { %v1105_v21 = vpop.f32.mrb[4].mxu0 }
 0x149   :  { %v1106_v9 = vpop.f32.mrb[5].mxu0 }
 0x14a   :  { %v1107_v25 = vadd.f32 %v1106_v9, %v1105_v21 }
 0x14c   :  { %v801_v26 = vadd.f32 %v1107_v25, %v633_v15 }
 0x151   :  { %v1140_v59 = vpop.f32.mrb[4].mxu1 }
 0x152   :  { %v1141_v28 = vpop.f32.mrb[5].mxu1 }
 0x153   :  { %v1142_v38 = vadd.f32 %v1141_v28, %v1140_v59 }
 0x155   :  { %v905_v40 = vadd.f32 %v1142_v38, %v801_v26 }
 0x157   :  { %911 = vst.msk [vmem:[#allocation2 + $0x2] sm:$0xf] %vm910_vm1, %v905_v40 }
 0x158   :  { %915 = vst.msk [vmem:[#allocation2 + $0x6] sm:$0xf0] %vm914_vm2, %v905_v40 }
 0x159   :  { %1350 = shalt.err (!%p1347_p4)
}
 0x15a   :  { %s1351_s24 = scalar_lea.hbm %s1896_s2, 256 }
 0x15b   :  { %p1352_p5 = scmp.ne.s32.totalorder %s1896_s2, %s1351_s24  ;;  %p1355_p6 = scmp.lt.u32.totalorder %s1351_s24, %s1896_s2 }
 0x15d   :  { %p1357_p7 = pnand %p1355_p6, %p1352_p5 }
 0x15f   :  { %1360 = shalt.err (!%p1357_p7)
}
 0x160   :  { %s1365_s29 = smov 128   ;;  %s1366_s30 = smov 8  }
 0x161   :  { %928 = dma.vmem_to_hbm [thread:$0]  %s923_s20, 256, %s1896_s2, [#allocation3], %s1365_s29, %s1365_s29, %s1366_s30  }
 0x162   :  { %1361 = dma.done.wait [#allocation3], 256  }
 0x163   :  { %1362 = vsyncadd [#allocation3], 4294967040 }
 0x164   :  { %932 = vsyncpa [#allocation3], 1 }

</bundles_post_ra>
